<compile_context>
chip_gen: v7x
topology: tpu7x:2x2x1
jax: 0.10.0
libtpu: 0.0.40
codegen_flags: <defaults>
</compile_context>

<pallas_src>
from functools import partial

import jax
import jax.numpy as jnp
from jax.experimental import pallas as pl
from jax.experimental.pallas import tpu as pltpu


def _round_up(n, m):
    return ((n + m - 1) // m) * m


def _tpu_info():
    """Best-effort (generation, vmem_capacity_bytes); conservative fallback."""
    gen = None
    try:
        kind = jax.devices()[0].device_kind.lower()
        for g in (7, 6, 5, 4):
            if f"v{g}" in kind:
                gen = g
                break
    except Exception:
        pass
    vmem_capacity = None
    try:
        vmem_capacity = int(pltpu.get_tpu_info().vmem_capacity_bytes)
    except Exception:
        vmem_capacity = None
    if vmem_capacity is None:
        # v7x has 64 MiB per TC; older gens 128 MiB.  Unknown -> conservative.
        vmem_capacity = (128 << 20) if gen in (4, 5, 6) else (64 << 20)
    return gen, vmem_capacity


def _pad_dim(size, gen):
    # v6e/v7x MXUs are 2x256x256: pad to 256 once the real width can fill them;
    # otherwise (and always on v5e's 4x128x128) pad to the 128-lane tile.
    granule = 256 if (gen is not None and gen >= 6 and size >= 256) else 128
    return _round_up(size, granule)


def _mlp_kernel(*refs, n_layers, compute_dtype, act_dtype):
    """refs = (x_ref, w1_ref, b1_ref, ..., wL_ref, bL_ref, out_ref).

    One grid step processes one batch tile.  Matmuls run on the MXU in
    `compute_dtype` with fp32 accumulation.  Hidden-layer bias + sigmoid run
    in `act_dtype` (bf16 on v6e/v7x, fp32 on v5e); the final Linear's bias add
    and output stay fp32.  Zero padding keeps the math exact: padded input
    lanes hit zero weight rows, and padded hidden lanes (sigmoid(0)=0.5) hit
    zero weight rows in the next layer, so they never pollute real outputs.
    """
    x_ref = refs[0]
    out_ref = refs[-1]
    h = x_ref[...]
    for l in range(n_layers):
        w_ref = refs[1 + 2 * l]
        b_ref = refs[2 + 2 * l]
        acc = jnp.dot(h.astype(compute_dtype), w_ref[...],
                      preferred_element_type=jnp.float32)
        if l < n_layers - 1:
            # Hidden layer: bias + sigmoid in act_dtype (VPU/EUP).
            h = acc.astype(act_dtype) + b_ref[...]
            # sigmoid(x) = 0.5 * tanh(x / 2) + 0.5 : single EUP transcendental,
            # no divide, no stability selects.
            h = jnp.tanh(h * act_dtype.type(0.5)) * act_dtype.type(0.5) + act_dtype.type(0.5)
        else:
            # Final Linear: keep fp32 for output accuracy.
            h = acc + b_ref[...]
    out_ref[...] = h.astype(out_ref.dtype)


def make_dnn_forward(params, *, compute_dtype=jnp.bfloat16, block_batch=None):
    """Pre-pads/casts params once; returns a jitted forward(x) -> [batch, out].

    params: list of (W [in,out] fp32, b [out] fp32) for every Linear, in order.
    """
    gen, vmem_capacity = _tpu_info()

    n_layers = len(params)
    in_dim = params[0][0].shape[0]
    sizes = [in_dim] + [w.shape[1] for w, _ in params]
    padded = [_pad_dim(s, gen) for s in sizes]

    # bf16 elementwise only where the VPU/EUP support it (v6e/v7x) and the
    # matmul path is already bf16; otherwise fp32 (always correct).
    use_bf16_elementwise = (compute_dtype == jnp.bfloat16
                            and gen is not None and gen >= 6)
    act_dtype = jnp.dtype(jnp.bfloat16) if use_bf16_elementwise else jnp.dtype(jnp.float32)

    if block_batch is None:
        # v5e: fp32 elementwise chain + single vst slot -> smaller batch tile.
        block_batch = 256 if gen == 5 else 512

    # --- one-time weight/bias padding + casting (hoisted out of the call path)
    flat_inputs = []
    for l, (w, b) in enumerate(params):
        w_p = jnp.zeros((padded[l], padded[l + 1]), compute_dtype)
        w_p = w_p.at[: w.shape[0], : w.shape[1]].set(w.astype(compute_dtype))
        bias_dtype = act_dtype if l < n_layers - 1 else jnp.dtype(jnp.float32)
        b_p = jnp.zeros((1, padded[l + 1]), bias_dtype)
        b_p = b_p.at[0, : b.shape[0]].set(b.astype(bias_dtype))
        flat_inputs.append(w_p)
        flat_inputs.append(b_p)
    flat_inputs = [jax.device_put(a) for a in flat_inputs]

    weight_bytes = sum(int(a.size) * a.dtype.itemsize for a in flat_inputs)
    # TODO(synk): if weight_bytes exceeds the per-TC VMEM budget (v7x @ 64 MiB),
    # stream the widest layer's weight column-blocks from HBM instead.

    sublane = 16 if compute_dtype == jnp.bfloat16 else 8
    out_dim = sizes[-1]
    kernel = partial(_mlp_kernel, n_layers=n_layers,
                     compute_dtype=compute_dtype, act_dtype=act_dtype)

    @jax.jit
    def forward(x):
        batch = x.shape[0]
        tb = min(block_batch, _round_up(batch, sublane))
        tb = _round_up(tb, sublane)
        batch_pad = _round_up(batch, tb)

        x_p = jnp.zeros((batch_pad, padded[0]), compute_dtype)
        x_p = x_p.at[:batch, :in_dim].set(x.astype(compute_dtype))

        grid = (batch_pad // tb,)

        in_specs = [pl.BlockSpec((tb, padded[0]), lambda i: (i, 0))]
        for l in range(n_layers):
            # Constant index_maps -> weights/biases stay VMEM-resident across
            # all batch tiles (no re-DMA per grid step).
            in_specs.append(pl.BlockSpec((padded[l], padded[l + 1]), lambda i: (0, 0)))
            in_specs.append(pl.BlockSpec((1, padded[l + 1]), lambda i: (0, 0)))
        out_specs = pl.BlockSpec((tb, padded[-1]), lambda i: (i, 0))

        # VMEM budget: resident weights + double-buffered x/out tiles, clamped
        # to ~85% of the physical per-TC capacity for this generation.
        act_bytes = 2 * 2 * tb * max(padded) * 4
        vmem_cap = int(0.85 * vmem_capacity)
        vmem_limit = int(min(max(2 * (weight_bytes + act_bytes) + (8 << 20),
                                 32 << 20),
                             vmem_cap))

        cost = pl.CostEstimate(
            flops=int(2 * batch * sum(sizes[i] * sizes[i + 1] for i in range(n_layers))),
            transcendentals=int(batch * sum(sizes[1:-1])),
            bytes_accessed=int(x.size * 4 + weight_bytes + batch * out_dim * 4),
        )

        out_padded = pl.pallas_call(
            kernel,
            out_shape=jax.ShapeDtypeStruct((batch_pad, padded[-1]), jnp.float32),
            grid=grid,
            in_specs=in_specs,
            out_specs=out_specs,
            compiler_params=pltpu.CompilerParams(
                dimension_semantics=("parallel",),   # 2-TC split on v7x
                vmem_limit_bytes=vmem_limit,
            ),
            cost_estimate=cost,
        )(x_p, *flat_inputs)

        return out_padded[:batch, :out_dim]   # slice fused under this jit

    return forward


def dnn_forward(x, params, *, compute_dtype=jnp.bfloat16, block_batch=None):
    """One-shot convenience wrapper (pads params every call; prefer make_dnn_forward)."""
    return make_dnn_forward(params, compute_dtype=compute_dtype,
                            block_batch=block_batch)(x)


def init_dnn_params(key, input_size, hidden_sizes, output_size):
    """Deterministic PyTorch-style Linear init: U(-1/sqrt(fan_in), 1/sqrt(fan_in))."""
    sizes = [input_size] + list(hidden_sizes) + [output_size]
    params = []
    for i in range(len(sizes) - 1):
        fan_in, fan_out = sizes[i], sizes[i + 1]
        key, kw, kb = jax.random.split(key, 3)
        bound = 1.0 / jnp.sqrt(jnp.float32(fan_in))
        w = jax.random.uniform(kw, (fan_in, fan_out), jnp.float32, -bound, bound)
        b = jax.random.uniform(kb, (fan_out,), jnp.float32, -bound, bound)
        params.append((w, b))
    return params


def dnn_forward_ref(x, params):
    """Pure-JAX reference for sanity checking the kernel."""
    h = x
    for i, (w, b) in enumerate(params):
        h = h @ w + b
        if i < len(params) - 1:
            h = jax.nn.sigmoid(h)
    return h


if __name__ == "__main__":
    # Small shapes consistent with DNN(inputSize, hiddenSizes, outputSize)
    input_size, hidden_sizes, output_size = 32, [64, 32], 4
    batch = 8

    key = jax.random.PRNGKey(0)
    key, kx = jax.random.split(key)
    x = jax.random.normal(kx, (batch, input_size), jnp.float32)
    params = init_dnn_params(key, input_size, hidden_sizes, output_size)

    ref = dnn_forward_ref(x, params)

    # fp32 matmul / fp32 elementwise path
    fwd_f32 = make_dnn_forward(params, compute_dtype=jnp.float32)
    out_f32 = jax.block_until_ready(fwd_f32(x))
    assert out_f32.shape == (batch, output_size)
    assert jnp.allclose(out_f32, ref, atol=2e-2, rtol=2e-2), "fp32 path mismatch"

    # default bf16-matmul path (bf16 elementwise on v6e/v7x, fp32 on v5e)
    fwd_bf16 = make_dnn_forward(params)
    out_bf16 = jax.block_until_ready(fwd_bf16(x))
    assert out_bf16.shape == (batch, output_size)
    assert jnp.allclose(out_bf16, ref, atol=3e-2, rtol=3e-2), "bf16 path mismatch"

    print("KERNEL_OK")
</pallas_src>

<mosaic_0001>
module attributes {stable_mosaic.version = 11 : i64} {
  func.func @_mlp_kernel(%arg0: i32, %arg1: memref<8x128xf32, #tpu.memory_space<vmem>>, %arg2: memref<128x128xf32, #tpu.memory_space<vmem>>, %arg3: memref<1x128xf32, #tpu.memory_space<vmem>>, %arg4: memref<128x128xf32, #tpu.memory_space<vmem>>, %arg5: memref<1x128xf32, #tpu.memory_space<vmem>>, %arg6: memref<128x128xf32, #tpu.memory_space<vmem>>, %arg7: memref<1x128xf32, #tpu.memory_space<vmem>>, %arg8: memref<8x128xf32, #tpu.memory_space<vmem>>) attributes {dimension_semantics = [#tpu.dimension_semantics<parallel>], iteration_bounds = array<i64: 1>, scalar_prefetch = 0 : i64, scratch_operands = 0 : i64, tpu.core_type = #tpu.core_type<tc>, window_params = [{transform_indices = @transform_0, window_bounds = array<i64: 8, 128>}, {pipeline_mode = #tpu.pipeline_mode<synchronous>, transform_indices = @transform_1, window_bounds = array<i64: 128, 128>}, {pipeline_mode = #tpu.pipeline_mode<synchronous>, transform_indices = @transform_2, window_bounds = array<i64: 1, 128>}, {pipeline_mode = #tpu.pipeline_mode<synchronous>, transform_indices = @transform_3, window_bounds = array<i64: 128, 128>}, {pipeline_mode = #tpu.pipeline_mode<synchronous>, transform_indices = @transform_4, window_bounds = array<i64: 1, 128>}, {pipeline_mode = #tpu.pipeline_mode<synchronous>, transform_indices = @transform_5, window_bounds = array<i64: 128, 128>}, {pipeline_mode = #tpu.pipeline_mode<synchronous>, transform_indices = @transform_6, window_bounds = array<i64: 1, 128>}, {transform_indices = @transform_7, window_bounds = array<i64: 8, 128>}]} {
    %c0 = arith.constant 0 : index
    %c0_0 = arith.constant 0 : index
    %0 = vector.load %arg1[%c0, %c0_0] : memref<8x128xf32, #tpu.memory_space<vmem>>, vector<8x128xf32>
    %c0_1 = arith.constant 0 : index
    %c0_2 = arith.constant 0 : index
    %1 = vector.load %arg2[%c0_1, %c0_2] : memref<128x128xf32, #tpu.memory_space<vmem>>, vector<128x128xf32>
    %cst = arith.constant dense<0.000000e+00> : vector<8x128xf32>
    %2 = tpu.matmul %0, %1, %cst {dimension_numbers = #tpu.dot_dimension_numbers<[1], [0], [0], [1], [0, 0, 1, 1], [], []>} : vector<8x128xf32>, vector<128x128xf32>, vector<8x128xf32> -> vector<8x128xf32>
    %c0_3 = arith.constant 0 : index
    %c0_4 = arith.constant 0 : index
    %3 = vector.load %arg3[%c0_3, %c0_4] : memref<1x128xf32, #tpu.memory_space<vmem>>, vector<1x128xf32>
    %4 = vector.broadcast %3 : vector<1x128xf32> to vector<8x128xf32>
    %5 = arith.addf %2, %4 : vector<8x128xf32>
    %cst_5 = arith.constant 5.000000e-01 : f32
    %6 = vector.broadcast %cst_5 : f32 to vector<8x128xf32>
    %7 = arith.mulf %5, %6 : vector<8x128xf32>
    %8 = math.tanh %7 : vector<8x128xf32>
    %cst_6 = arith.constant 5.000000e-01 : f32
    %9 = vector.broadcast %cst_6 : f32 to vector<8x128xf32>
    %10 = arith.mulf %8, %9 : vector<8x128xf32>
    %cst_7 = arith.constant 5.000000e-01 : f32
    %11 = vector.broadcast %cst_7 : f32 to vector<8x128xf32>
    %12 = arith.addf %10, %11 : vector<8x128xf32>
    %c0_8 = arith.constant 0 : index
    %c0_9 = arith.constant 0 : index
    %13 = vector.load %arg4[%c0_8, %c0_9] : memref<128x128xf32, #tpu.memory_space<vmem>>, vector<128x128xf32>
    %cst_10 = arith.constant dense<0.000000e+00> : vector<8x128xf32>
    %14 = tpu.matmul %12, %13, %cst_10 {dimension_numbers = #tpu.dot_dimension_numbers<[1], [0], [0], [1], [0, 0, 1, 1], [], []>} : vector<8x128xf32>, vector<128x128xf32>, vector<8x128xf32> -> vector<8x128xf32>
    %c0_11 = arith.constant 0 : index
    %c0_12 = arith.constant 0 : index
    %15 = vector.load %arg5[%c0_11, %c0_12] : memref<1x128xf32, #tpu.memory_space<vmem>>, vector<1x128xf32>
    %16 = vector.broadcast %15 : vector<1x128xf32> to vector<8x128xf32>
    %17 = arith.addf %14, %16 : vector<8x128xf32>
    %cst_13 = arith.constant 5.000000e-01 : f32
    %18 = vector.broadcast %cst_13 : f32 to vector<8x128xf32>
    %19 = arith.mulf %17, %18 : vector<8x128xf32>
    %20 = math.tanh %19 : vector<8x128xf32>
    %cst_14 = arith.constant 5.000000e-01 : f32
    %21 = vector.broadcast %cst_14 : f32 to vector<8x128xf32>
    %22 = arith.mulf %20, %21 : vector<8x128xf32>
    %cst_15 = arith.constant 5.000000e-01 : f32
    %23 = vector.broadcast %cst_15 : f32 to vector<8x128xf32>
    %24 = arith.addf %22, %23 : vector<8x128xf32>
    %c0_16 = arith.constant 0 : index
    %c0_17 = arith.constant 0 : index
    %25 = vector.load %arg6[%c0_16, %c0_17] : memref<128x128xf32, #tpu.memory_space<vmem>>, vector<128x128xf32>
    %cst_18 = arith.constant dense<0.000000e+00> : vector<8x128xf32>
    %26 = tpu.matmul %24, %25, %cst_18 {dimension_numbers = #tpu.dot_dimension_numbers<[1], [0], [0], [1], [0, 0, 1, 1], [], []>} : vector<8x128xf32>, vector<128x128xf32>, vector<8x128xf32> -> vector<8x128xf32>
    %c0_19 = arith.constant 0 : index
    %c0_20 = arith.constant 0 : index
    %27 = vector.load %arg7[%c0_19, %c0_20] : memref<1x128xf32, #tpu.memory_space<vmem>>, vector<1x128xf32>
    %28 = vector.broadcast %27 : vector<1x128xf32> to vector<8x128xf32>
    %29 = arith.addf %26, %28 : vector<8x128xf32>
    %c0_21 = arith.constant 0 : index
    %c0_22 = arith.constant 0 : index
    %30 = vector.load %arg8[%c0_21, %c0_22] : memref<8x128xf32, #tpu.memory_space<vmem>>, vector<8x128xf32>
    tpu.vector_store %arg8[%c0_21, %c0_22], %29 {strides = array<i32>} : memref<8x128xf32, #tpu.memory_space<vmem>>, vector<8x128xf32>,
    return
  }
  func.func @transform_0(%arg0: i32) -> (i32, i32) {
    %c0_i32 = arith.constant 0 : i32
    %c0_i32_0 = arith.constant 0 : i32
    return %arg0, %c0_i32 : i32, i32
  }
  func.func @transform_1(%arg0: i32) -> (i32, i32) {
    %c0_i32 = arith.constant 0 : i32
    %c0_i32_0 = arith.constant 0 : i32
    %c0_i32_1 = arith.constant 0 : i32
    return %c0_i32, %c0_i32_0 : i32, i32
  }
  func.func @transform_2(%arg0: i32) -> (i32, i32) {
    %c0_i32 = arith.constant 0 : i32
    %c0_i32_0 = arith.constant 0 : i32
    %c0_i32_1 = arith.constant 0 : i32
    return %c0_i32, %c0_i32_0 : i32, i32
  }
  func.func @transform_3(%arg0: i32) -> (i32, i32) {
    %c0_i32 = arith.constant 0 : i32
    %c0_i32_0 = arith.constant 0 : i32
    %c0_i32_1 = arith.constant 0 : i32
    return %c0_i32, %c0_i32_0 : i32, i32
  }
  func.func @transform_4(%arg0: i32) -> (i32, i32) {
    %c0_i32 = arith.constant 0 : i32
    %c0_i32_0 = arith.constant 0 : i32
    %c0_i32_1 = arith.constant 0 : i32
    return %c0_i32, %c0_i32_0 : i32, i32
  }
  func.func @transform_5(%arg0: i32) -> (i32, i32) {
    %c0_i32 = arith.constant 0 : i32
    %c0_i32_0 = arith.constant 0 : i32
    %c0_i32_1 = arith.constant 0 : i32
    return %c0_i32, %c0_i32_0 : i32, i32
  }
  func.func @transform_6(%arg0: i32) -> (i32, i32) {
    %c0_i32 = arith.constant 0 : i32
    %c0_i32_0 = arith.constant 0 : i32
    %c0_i32_1 = arith.constant 0 : i32
    return %c0_i32, %c0_i32_0 : i32, i32
  }
  func.func @transform_7(%arg0: i32) -> (i32, i32) {
    %c0_i32 = arith.constant 0 : i32
    %c0_i32_0 = arith.constant 0 : i32
    return %arg0, %c0_i32 : i32, i32
  }
}

</mosaic_0001>

<bundles_post_ra>
// kernel: forward.1
= control target key start
LH: loop header
LB: loop body
LE: loop exit
PB: predicated region body
PF: predicated region fallthrough
CT: control target
= control target key end

     0   :  { %12 = vsyncpa [#allocation3], 0  ;;  %s817_s0 = inlined_call_operand.vmem [shape: f32[8,128], index: 0, kind: input, shape index: {}]   ;;  %s818_s1 = inlined_call_operand.hbm [shape: f32[128,128], index: 1, kind: input, shape index: {}]   ;;  %s819_s2 = inlined_call_operand.vmem [shape: f32[1,128], index: 2, kind: input, shape index: {}]   ;;  %s820_s3 = inlined_call_operand.hbm [shape: f32[128,128], index: 3, kind: input, shape index: {}]   ;;  %s821_s4 = inlined_call_operand.vmem [shape: f32[1,128], index: 4, kind: input, shape index: {}]   ;;  %s822_s5 = inlined_call_operand.hbm [shape: f32[128,128], index: 5, kind: input, shape index: {}]   ;;  %s823_s6 = inlined_call_operand.vmem [shape: f32[1,128], index: 6, kind: input, shape index: {}]   ;;  %s824_s7 = inlined_call_operand.vmem [shape: f32[8,128], index: 7, kind: output, shape index: {}]  }
   0x1   :  { %13 = vsyncpa [#allocation5], 0  ;;  %s675_s24 = smov [#allocation4]   ;;  %s676_s26 = smov [#allocation2]  }
   0x2   :  { %s35_s25 = sshll.u32 %s675_s24, 4  ;;  %s21_s27 = sshll.u32 %s676_s26, 4  ;;  %s36_s25 = int_to_ptr.vmem [resolvable:$true] %s35_s25  ;;  %s723_s27 = int_to_ptr.vmem [resolvable:$true] %s21_s27 }
   0x3   :  { %s605_s30 = scalar_lea.hbm %s820_s3, 2048 }
   0x4   :  { %p606_p0 = scmp.ne.s32.totalorder %s820_s3, %s605_s30  ;;  %p609_p1 = scmp.lt.u32.totalorder %s605_s30, %s820_s3 }
   0x6   :  { %p611_p2 = pnand %p609_p1, %p606_p0 }
   0x8   :  { %614 = shalt.err (!%p611_p2)
}
   0x9   :  { %s615_s12 = scalar_lea.vmem %s36_s25, 2048  ;;  %p620_p4 = scmp.lt.s32.totalorder %s36_s25, %s36_s25 }
   0xa   :  { %p616_p3 = scmp.ne.s32.totalorder %s36_s25, %s615_s12  ;;  %p621_p5 = scmp.lt.s32.totalorder %s615_s12, %s615_s12 }
   0xc   :  { %p622_p6 = por %p621_p5, %p620_p4 }
   0xe   :  { %p623_p7 = pnand %p622_p6, %p616_p3 }
  0x10   :  { %626 = shalt.err (!%p623_p7)
}
  0x11   :  { %s677_s13 = smov 128   ;;  %s678_s14 = smov 8  }
  0x12   :  { %41 = dma.hbm_to_vmem [thread:$0]  %s820_s3, 2048, %s36_s25, [#allocation5], %s677_s13, %s677_s13, %s678_s14  }
  0x13   :  { %s627_s19 = scalar_lea.hbm %s818_s1, 2048 }
  0x14   :  { %p628_p8 = scmp.ne.s32.totalorder %s818_s1, %s627_s19  ;;  %p631_p9 = scmp.lt.u32.totalorder %s627_s19, %s818_s1 }
  0x16   :  { %p633_p10 = pnand %p631_p9, %p628_p8 }
  0x18   :  { %636 = shalt.err (!%p633_p10)
}
  0x19   :  { %s637_s24 = scalar_lea.vmem %s723_s27, 2048  ;;  %p642_p12 = scmp.lt.s32.totalorder %s723_s27, %s723_s27 }
  0x1a   :  { %p638_p11 = scmp.ne.s32.totalorder %s723_s27, %s637_s24  ;;  %p643_p13 = scmp.lt.s32.totalorder %s637_s24, %s637_s24 }
  0x1c   :  { %p644_p0 = por %p643_p13, %p642_p12 }
  0x1e   :  { %p645_p1 = pnand %p644_p0, %p638_p11 }
  0x20   :  { %648 = shalt.err (!%p645_p1)
}
  0x21   :  { %27 = dma.hbm_to_vmem [thread:$0]  %s818_s1, 2048, %s723_s27, [#allocation3], %s677_s13, %s677_s13, %s678_s14  }
  0x22   :  { %s679_s26 = smov [#allocation6]   ;;  %s649_s8 = scalar_lea.hbm %s822_s5, 2048 }
  0x23   :  { %s49_s28 = sshll.u32 %s679_s26, 4  ;;  %p650_p2 = scmp.ne.s32.totalorder %s822_s5, %s649_s8  ;;  %s50_s28 = int_to_ptr.vmem [resolvable:$true] %s49_s28 }
  0x24   :  { %p653_p3 = scmp.lt.u32.totalorder %s649_s8, %s822_s5 }
  0x26   :  { %p655_p4 = pnand %p653_p3, %p650_p2 }
  0x28   :  { %658 = shalt.err (!%p655_p4)
}
  0x29   :  { %s659_s15 = scalar_lea.vmem %s50_s28, 2048  ;;  %p664_p6 = scmp.lt.s32.totalorder %s50_s28, %s50_s28 }
  0x2a   :  { %p660_p5 = scmp.ne.s32.totalorder %s50_s28, %s659_s15  ;;  %p665_p7 = scmp.lt.s32.totalorder %s659_s15, %s659_s15 }
  0x2c   :  { %p666_p8 = por %p665_p7, %p664_p6 }
  0x2e   :  { %p667_p9 = pnand %p666_p8, %p660_p5 }
  0x30   :  { %670 = shalt.err (!%p667_p9)
}
  0x31   :  { %55 = dma.hbm_to_vmem [thread:$0]  %s822_s5, 2048, %s50_s28, [#allocation5], %s677_s13, %s677_s13, %s678_s14  }
  0x32   :  { %671 = dma.done.wait [#allocation3], 2048  }
  0x33   :  { %672 = vsyncadd [#allocation3], 4294965248 }
  0x34   :  { %673 = dma.done.wait [#allocation5], 4096  }
  0x35   :  { %674 = vsyncadd [#allocation5], 4294963200  ;;  %v680_v0 = vmov 0.0|0.0   ;;  %vm681_vm0 = vmmov 0   ;;  %v682_v1 = vmov 0.0   ;;  %v68_v2 = vld [vmem:[#allocation2] sm:$0xff] }
  0x36   :  { %521 = vmatprep.subr.bf16.mxu0 %v680_v0  ;;  %448 = vmatprep.mubr.msk.f32.mxu0 %vm681_vm0, %v682_v1  ;;  %v69_v3 = vld [vmem:[#allocation2 + $0x8] sm:$0xff]  ;;  %v70_v4 = vld [vmem:[#allocation2 + $0x10] sm:$0xff]  ;;  %v71_v6 = vld [vmem:[#allocation2 + $0x18] sm:$0xff] }
  0x37   :  { %545 = vmatprep.subr.bf16.mxu1 %v680_v0  ;;  %483 = vmatprep.mubr.msk.f32.mxu1 %vm681_vm0, %v682_v1  ;;  %v522_v5 = vpack.c.bf16 %v69_v3, %v68_v2  ;;  %v525_v7 = vpack.c.bf16 %v71_v6, %v70_v4  ;;  %v72_v8 = vld [vmem:[#allocation2 + $0x20] sm:$0xff]  ;;  %v73_v9 = vld [vmem:[#allocation2 + $0x28] sm:$0xff]  ;;  %v167_v12 = vld [vmem:[#allocation4 + $0x10] sm:$0xff] }
  0x38   :  { %v165_v10 = vld [vmem:[#allocation4] sm:$0xff]  ;;  %v166_v11 = vld [vmem:[#allocation4 + $0x8] sm:$0xff]  ;;  %v168_v13 = vld [vmem:[#allocation4 + $0x18] sm:$0xff]  ;;  %v528_v14 = vpack.c.bf16 %v73_v9, %v72_v8 }
  0x39   :  { %523 = vmatpush3.bf16.msra.mxu0 %v522_v5  ;;  %v546_v15 = vpack.c.bf16 %v166_v11, %v165_v10  ;;  %v74_v16 = vld [vmem:[#allocation2 + $0x30] sm:$0xff]  ;;  %v75_v17 = vld [vmem:[#allocation2 + $0x38] sm:$0xff]  ;;  %v549_v18 = vpack.c.bf16 %v168_v13, %v167_v12  ;;  %v169_v19 = vld [vmem:[#allocation4 + $0x20] sm:$0xff] }
  0x3a   :  { %524 = vmatprep.subr.bf16.mxu0 %v680_v0  ;;  %v170_v20 = vld [vmem:[#allocation4 + $0x28] sm:$0xff]  ;;  %v531_v21 = vpack.c.bf16 %v75_v17, %v74_v16  ;;  %v76_v22 = vld [vmem:[#allocation2 + $0x40] sm:$0xff]  ;;  %v78_v26 = vld [vmem:[#allocation2 + $0x50] sm:$0xff] }
  0x3b   :  { %547 = vmatpush3.bf16.msra.mxu1 %v546_v15  ;;  %v77_v23 = vld [vmem:[#allocation2 + $0x48] sm:$0xff]  ;;  %v552_v24 = vpack.c.bf16 %v170_v20, %v169_v19  ;;  %v79_v27 = vld [vmem:[#allocation2 + $0x58] sm:$0xff]  ;;  %v80_v29 = vld [vmem:[#allocation2 + $0x60] sm:$0xff] }
  0x3c   :  { %548 = vmatprep.subr.bf16.mxu1 %v680_v0  ;;  %v534_v25 = vpack.c.bf16 %v77_v23, %v76_v22  ;;  %v537_v28 = vpack.c.bf16 %v79_v27, %v78_v26  ;;  %v81_v30 = vld [vmem:[#allocation2 + $0x68] sm:$0xff]  ;;  %v82_v32 = vld [vmem:[#allocation2 + $0x70] sm:$0xff]  ;;  %v83_v33 = vld [vmem:[#allocation2 + $0x78] sm:$0xff] }
  0x3d   :  { %526 = vmatpush3.bf16.msra.mxu0 %v525_v7  ;;  %v540_v31 = vpack.c.bf16 %v81_v30, %v80_v29  ;;  %v543_v34 = vpack.c.bf16 %v83_v33, %v82_v32  ;;  %v67_v35 = vld [vmem:[%s817_s0] sm:$0xff]  ;;  %v171_v36 = vld [vmem:[#allocation4 + $0x30] sm:$0xff]  ;;  %v172_v37 = vld [vmem:[#allocation4 + $0x38] sm:$0xff] }
  0x3e   :  { %527 = vmatprep.subr.bf16.mxu0 %v680_v0  ;;  %v555_v38 = vpack.c.bf16 %v172_v37, %v171_v36  ;;  %v173_v39 = vld [vmem:[#allocation4 + $0x40] sm:$0xff]  ;;  %v174_v40 = vld [vmem:[#allocation4 + $0x48] sm:$0xff]  ;;  %v175_v42 = vld [vmem:[#allocation4 + $0x50] sm:$0xff] }
  0x3f   :  { %550 = vmatpush3.bf16.msra.mxu1 %v549_v18  ;;  %v558_v41 = vpack.c.bf16 %v174_v40, %v173_v39  ;;  %v176_v43 = vld [vmem:[#allocation4 + $0x58] sm:$0xff]  ;;  %v177_v45 = vld [vmem:[#allocation4 + $0x60] sm:$0xff]  ;;  %v178_v46 = vld [vmem:[#allocation4 + $0x68] sm:$0xff] }
  0x40   :  { %551 = vmatprep.subr.bf16.mxu1 %v680_v0  ;;  %v561_v44 = vpack.c.bf16 %v176_v43, %v175_v42  ;;  %v564_v47 = vpack.c.bf16 %v178_v46, %v177_v45  ;;  %v179_v48 = vld [vmem:[#allocation4 + $0x70] sm:$0xff]  ;;  %v180_v49 = vld [vmem:[#allocation4 + $0x78] sm:$0xff]  ;;  %v262_v51 = vld [vmem:[#allocation6] sm:$0xff] }
  0x41   :  { %529 = vmatpush3.bf16.msra.mxu0 %v528_v14  ;;  %v567_v50 = vpack.c.bf16 %v180_v49, %v179_v48  ;;  %v263_v52 = vld [vmem:[#allocation6 + $0x8] sm:$0xff]  ;;  %v264_v53 = vld [vmem:[#allocation6 + $0x10] sm:$0xff]  ;;  %v265_v55 = vld [vmem:[#allocation6 + $0x18] sm:$0xff] }
  0x42   :  { %530 = vmatprep.subr.bf16.mxu0 %v680_v0  ;;  %v570_v54 = vpack.c.bf16 %v263_v52, %v262_v51  ;;  %v573_v56 = vpack.c.bf16 %v265_v55, %v264_v53  ;;  %v266_v57 = vld [vmem:[#allocation6 + $0x20] sm:$0xff]  ;;  %v267_v58 = vld [vmem:[#allocation6 + $0x28] sm:$0xff]  ;;  %v268_v5 = vld [vmem:[#allocation6 + $0x30] sm:$0xff] }
  0x43   :  { %553 = vmatpush3.bf16.msra.mxu1 %v552_v24  ;;  %v576_v59 = vpack.c.bf16 %v267_v58, %v266_v57  ;;  %v362_v60 = vld [vmem:[%s819_s2] ss:$0 sm:$0xff]  ;;  %v269_v6 = vld [vmem:[#allocation6 + $0x38] sm:$0xff]  ;;  %v271_v9 = vld [vmem:[#allocation6 + $0x48] sm:$0xff] }
  0x44   :  { %554 = vmatprep.subr.bf16.mxu1 %v680_v0  ;;  %v579_v7 = vpack.c.bf16 %v269_v6, %v268_v5  ;;  %v270_v8 = vld [vmem:[#allocation6 + $0x40] sm:$0xff]  ;;  %v272_v11 = vld [vmem:[#allocation6 + $0x50] sm:$0xff]  ;;  %v273_v12 = vld [vmem:[#allocation6 + $0x58] sm:$0xff] }
  0x45   :  { %532 = vmatpush3.bf16.msra.mxu0 %v531_v21  ;;  %v582_v10 = vpack.c.bf16 %v271_v9, %v270_v8  ;;  %v585_v13 = vpack.c.bf16 %v273_v12, %v272_v11  ;;  %v274_v14 = vld [vmem:[#allocation6 + $0x60] sm:$0xff]  ;;  %v275_v15 = vld [vmem:[#allocation6 + $0x68] sm:$0xff]  ;;  %v276_v17 = vld [vmem:[#allocation6 + $0x70] sm:$0xff] }
  0x46   :  { %533 = vmatprep.subr.bf16.mxu0 %v680_v0  ;;  %v588_v16 = vpack.c.bf16 %v275_v15, %v274_v14  ;;  %v277_v18 = vld [vmem:[#allocation6 + $0x78] sm:$0xff]  ;;  %v363_v20 = vld [vmem:[%s821_s4] ss:$0 sm:$0xff] }
  0x47   :  { %556 = vmatpush3.bf16.msra.mxu1 %v555_v38  ;;  %v591_v19 = vpack.c.bf16 %v277_v18, %v276_v17 }
  0x48   :  { %557 = vmatprep.subr.bf16.mxu1 %v680_v0 }
  0x49   :  { %535 = vmatpush3.bf16.msra.mxu0 %v534_v25 }
  0x4a   :  { %536 = vmatprep.subr.bf16.mxu0 %v680_v0 }
  0x4b   :  { %559 = vmatpush3.bf16.msra.mxu1 %v558_v41 }
  0x4c   :  { %560 = vmatprep.subr.bf16.mxu1 %v680_v0 }
  0x4d   :  { %538 = vmatpush3.bf16.msra.mxu0 %v537_v28 }
  0x4e   :  { %539 = vmatprep.subr.bf16.mxu0 %v680_v0 }
  0x4f   :  { %562 = vmatpush3.bf16.msra.mxu1 %v561_v44 }
  0x50   :  { %563 = vmatprep.subr.bf16.mxu1 %v680_v0 }
  0x51   :  { %541 = vmatpush3.bf16.msra.mxu0 %v540_v31 }
  0x52   :  { %542 = vmatprep.subr.bf16.mxu0 %v680_v0 }
  0x53   :  { %565 = vmatpush3.bf16.msra.mxu1 %v564_v47 }
  0x54   :  { %566 = vmatprep.subr.bf16.mxu1 %v680_v0 }
  0x55   :  { %544 = vmatpush3.bf16.msra.mxu0 %v543_v34 }
  0x56   :  { %569 = vmatprep.subr.bf16.mxu0 %v680_v0 }
  0x57   :  { %568 = vmatpush3.bf16.msra.mxu1 %v567_v50 }
  0x58   :  { %449 = vmatmul.mubr.f32.vlgmr.msra.gmra.mrb[0].mxu0 %v67_v35 }
  0x59   :  { %518 = vmatprep.mubr.msk.f32.mxu0 %vm681_vm0, %v682_v1  ;;  %571 = vmatpush3.bf16.msra.mxu0 %v570_v54 }
  0x5a   :  { %572 = vmatprep.subr.bf16.mxu0 %v680_v0 }
  0x5d   :  { %574 = vmatpush3.bf16.msra.mxu0 %v573_v56 }
  0x5e   :  { %575 = vmatprep.subr.bf16.mxu0 %v680_v0 }
  0x61   :  { %577 = vmatpush3.bf16.msra.mxu0 %v576_v59 }
  0x62   :  { %578 = vmatprep.subr.bf16.mxu0 %v680_v0 }
  0x65   :  { %580 = vmatpush3.bf16.msra.mxu0 %v579_v7 }
  0x66   :  { %581 = vmatprep.subr.bf16.mxu0 %v680_v0 }
  0x69   :  { %583 = vmatpush3.bf16.msra.mxu0 %v582_v10 }
  0x6a   :  { %584 = vmatprep.subr.bf16.mxu0 %v680_v0 }
  0x6d   :  { %586 = vmatpush3.bf16.msra.mxu0 %v585_v13 }
  0x6e   :  { %587 = vmatprep.subr.bf16.mxu0 %v680_v0 }
  0x71   :  { %589 = vmatpush3.bf16.msra.mxu0 %v588_v16 }
  0x72   :  { %590 = vmatprep.subr.bf16.mxu0 %v680_v0  ;;  %v364_v0 = vld [vmem:[%s823_s6] ss:$0 sm:$0xff] }
  0x75   :  { %592 = vmatpush3.bf16.msra.mxu0 %v591_v19 }
 0x12b   :  { %v157_v61 = vpop.f32.mrb[0].mxu0 }
 0x12c   :  { %v158_v62 = vadd.f32 %v362_v60, %v157_v61  ;;  %v450_v63 = vpop.f32.mrb[1].mxu0 }
 0x12e   :  { %v161_v1 = vmul.f32 0.5, %v158_v62 }
 0x130   :  { %601 = vtanh.f32 %v161_v1 }
 0x13a   :  { %v602_v2 = vpop.eup %601 }
 0x13b   :  { %v163_v3 = vmul.f32 0.5, %v602_v2 }
 0x13d   :  { %v164_v4 = vadd.f32 0.5, %v163_v3 }
 0x13f   :  { %484 = vmatmul.mubr.f32.vlgmr.msra.gmra.mrb[0].mxu1 %v164_v4 }
 0x212   :  { %v254_v21 = vpop.f32.mrb[0].mxu1 }
 0x213   :  { %v255_v22 = vadd.f32 %v363_v20, %v254_v21  ;;  %v485_v23 = vpop.f32.mrb[1].mxu1 }
 0x215   :  { %v258_v24 = vmul.f32 0.5, %v255_v22 }
 0x217   :  { %603 = vtanh.f32 %v258_v24 }
 0x221   :  { %v604_v25 = vpop.eup %603 }
 0x222   :  { %v260_v26 = vmul.f32 0.5, %v604_v25 }
 0x224   :  { %v261_v27 = vadd.f32 0.5, %v260_v26 }
 0x226   :  { %519 = vmatmul.mubr.f32.vlgmr.msra.gmra.mrb[2].mxu0 %v261_v27 }
 0x2f9   :  { %v351_v28 = vpop.f32.mrb[2].mxu0 }
 0x2fa   :  { %v352_v29 = vadd.f32 %v364_v0, %v351_v28  ;;  %v520_v30 = vpop.f32.mrb[3].mxu0 }
 0x2fc   :  { %355 = vst [vmem:[%s824_s7] sm:$0xff] %v352_v29 }
 0x2fd   :  { %360 = vsyncpa [#allocation3], 1 }
 0x2fe   :  { %361 = vsyncpa [#allocation5], 1 }

</bundles_post_ra>
